<compile_context>
chip_gen: v6e
topology: v6e:2x2x1
jax: 0.10.0
libtpu: 0.0.40
codegen_flags: <defaults>
</compile_context>

<pallas_src>
import functools

import jax
import jax.numpy as jnp
from jax.experimental import pallas as pl
from jax.experimental.pallas import tpu as pltpu


# ----------------------------------------------------------------------------
# Pallas kernels
# ----------------------------------------------------------------------------
def _bilstm_kernel(xpf_ref, xpb_ref, whh_ref, of_ref, ob_ref, h_scr, c_scr):
    """Fused forward+backward LSTM step. grid=(S,).

    xpf_ref: (1, B, 8*Hh)  precomputed x@W_ih + bias at time t     (fwd: cols [0:4Hh])
    xpb_ref: (1, B, 8*Hh)  precomputed x@W_ih + bias at time S-1-t (bwd: cols [4Hh:8Hh])
    whh_ref: (2*Hh, 8*Hh)  block-diagonal [W_hh_f^T, 0; 0, W_hh_b^T]
    of_ref:  (1, B, Hh)    forward hidden, written at time t
    ob_ref:  (1, B, Hh)    backward hidden, written at time S-1-t
    h_scr:   (B, 2*Hh)     [h_fwd | h_bwd], persistent across grid steps
    c_scr:   (B, 2*Hh)     [c_fwd | c_bwd]
    """
    t = pl.program_id(0)
    hh = of_ref.shape[-1]

    @pl.when(t == 0)
    def _():
        h_scr[...] = jnp.zeros_like(h_scr)
        c_scr[...] = jnp.zeros_like(c_scr)

    # Both directions' recurrent contribution in one MXU op: (B,2Hh)@(2Hh,8Hh).
    gh = jnp.dot(h_scr[...], whh_ref[...], preferred_element_type=jnp.float32)
    gates_f = xpf_ref[0][:, 0:4 * hh] + gh[:, 0:4 * hh]
    gates_b = xpb_ref[0][:, 4 * hh:8 * hh] + gh[:, 4 * hh:8 * hh]
    c_prev = c_scr[...]

    def cell(gates, c_old):
        i_g = jax.nn.sigmoid(gates[:, 0 * hh:1 * hh])
        f_g = jax.nn.sigmoid(gates[:, 1 * hh:2 * hh])
        g_g = jnp.tanh(gates[:, 2 * hh:3 * hh])
        o_g = jax.nn.sigmoid(gates[:, 3 * hh:4 * hh])
        c_new = f_g * c_old + i_g * g_g
        return o_g * jnp.tanh(c_new), c_new

    h_f, c_f = cell(gates_f, c_prev[:, 0:hh])
    h_b, c_b = cell(gates_b, c_prev[:, hh:2 * hh])

    h_scr[...] = jnp.concatenate([h_f, h_b], axis=1)
    c_scr[...] = jnp.concatenate([c_f, c_b], axis=1)
    of_ref[0] = h_f
    ob_ref[0] = h_b


def _proj_kernel(xf_ref, xb_ref, w_ref, b_ref, out_ref):
    """Hoisted input projection for LSTM layers >= 1. grid=(1,).

    xf_ref/xb_ref: (S*B, Hh)   flattened (time-major) fwd/bwd outputs of prev layer
    w_ref:         (2*Hh, 8*Hh) concatenated [W_ih_f^T | W_ih_b^T] (rows: [fwd|bwd] channels)
    b_ref:         (1, 8*Hh)    summed gate biases, both directions
    out_ref:       (S*B, 8*Hh)
    """
    hh = xf_ref.shape[-1]
    out_ref[...] = (
        jnp.dot(xf_ref[...], w_ref[0:hh, :], preferred_element_type=jnp.float32)
        + jnp.dot(xb_ref[...], w_ref[hh:2 * hh, :], preferred_element_type=jnp.float32)
        + b_ref[...])


def _conv_predict_kernel(xf_ref, xb_ref, wc_ref, bc_ref, wp_ref, bp_ref,
                         out_ref, y_scr):
    """Fused Conv1d(k=3,pad=1) + ReLU + folded (Linear @ emb^T). grid=(1,).

    xf_ref/xb_ref: (S*B, Hh)  flattened time-major rows (row = s*B + b)
    wc_ref:        (3, 2*Hh, H)  conv taps, w[k, c_in, c_out]
    bc_ref:        (1, H)
    wp_ref:        (H, V)     folded  W_lin^T @ emb^T
    bp_ref:        (1, V)     folded  b_lin @ emb^T
    out_ref:       (B, S, V)
    y_scr:         (S*B, V)   VMEM scratch for the logits
    """
    bsz, s, _ = out_ref.shape
    h = bc_ref.shape[-1]

    x = jnp.concatenate([xf_ref[...], xb_ref[...]], axis=1)          # (S*B, 2Hh)
    p0 = jnp.dot(x, wc_ref[0], preferred_element_type=jnp.float32)   # tap k=0 -> x[s-1]
    p1 = jnp.dot(x, wc_ref[1], preferred_element_type=jnp.float32)   # tap k=1 -> x[s]
    p2 = jnp.dot(x, wc_ref[2], preferred_element_type=jnp.float32)   # tap k=2 -> x[s+1]

    # Shifting by one time step == shifting by B rows in time-major-flat layout;
    # batch boundaries are never crossed and the halo rows are zero.
    zpad = jnp.zeros((bsz, h), jnp.float32)
    y = (p1
         + jnp.concatenate([zpad, p0[:-bsz, :]], axis=0)
         + jnp.concatenate([p2[bsz:, :], zpad], axis=0)
         + bc_ref[...])
    y = jnp.maximum(y, 0.0)                                          # (S*B, H)

    y_scr[...] = (jnp.dot(y, wp_ref[...], preferred_element_type=jnp.float32)
                  + bp_ref[...])                                     # (S*B, V)
    # De-interleave rows (s*B + b) -> (B, S, V) with strided reads.
    for bi in range(bsz):
        out_ref[bi] = y_scr[pl.ds(bi, s, stride=bsz), :]


# ----------------------------------------------------------------------------
# pallas_call wrappers
# ----------------------------------------------------------------------------
def _run_bilstm_layer(xproj_tm, whh_bd, hh):
    """xproj_tm: (S, B, 8*Hh) time-major pre-activations. Returns ((S,B,Hh), (S,B,Hh))."""
    s, b, g8 = xproj_tm.shape
    return pl.pallas_call(
        _bilstm_kernel,
        out_shape=(jax.ShapeDtypeStruct((s, b, hh), jnp.float32),
                   jax.ShapeDtypeStruct((s, b, hh), jnp.float32)),
        grid_spec=pltpu.PrefetchScalarGridSpec(
            num_scalar_prefetch=0,
            grid=(s,),
            in_specs=[
                pl.BlockSpec((1, b, g8), lambda t: (t, 0, 0)),          # fwd time slice
                pl.BlockSpec((1, b, g8), lambda t: (s - 1 - t, 0, 0)),  # bwd time slice
                pl.BlockSpec((2 * hh, g8), lambda t: (0, 0)),
            ],
            out_specs=[
                pl.BlockSpec((1, b, hh), lambda t: (t, 0, 0)),
                pl.BlockSpec((1, b, hh), lambda t: (s - 1 - t, 0, 0)),
            ],
            scratch_shapes=[
                pltpu.VMEM((b, 2 * hh), jnp.float32),
                pltpu.VMEM((b, 2 * hh), jnp.float32),
            ],
        ),
        compiler_params=pltpu.CompilerParams(dimension_semantics=("arbitrary",)),
    )(xproj_tm, xproj_tm, whh_bd)


def _run_proj(xf_flat, xb_flat, w_cat, bias_cat):
    """Flattened input projection for layers >= 1. Returns (S*B, 8*Hh)."""
    n, hh = xf_flat.shape
    g8 = w_cat.shape[-1]
    return pl.pallas_call(
        _proj_kernel,
        out_shape=jax.ShapeDtypeStruct((n, g8), jnp.float32),
        grid_spec=pltpu.PrefetchScalarGridSpec(
            num_scalar_prefetch=0,
            grid=(1,),
            in_specs=[
                pl.BlockSpec((n, hh), lambda i: (0, 0)),
                pl.BlockSpec((n, hh), lambda i: (0, 0)),
                pl.BlockSpec(w_cat.shape, lambda i: (0, 0)),
                pl.BlockSpec(bias_cat.shape, lambda i: (0, 0)),
            ],
            out_specs=pl.BlockSpec((n, g8), lambda i: (0, 0)),
        ),
        compiler_params=pltpu.CompilerParams(dimension_semantics=("arbitrary",)),
    )(xf_flat, xb_flat, w_cat, bias_cat)


def _run_conv_predict(xf_flat, xb_flat, wc, bc, wp, bp, batch, seq):
    """Fused conv+relu+predict on flattened rows. Returns (B, S, V)."""
    n, hh = xf_flat.shape
    v = wp.shape[-1]
    return pl.pallas_call(
        _conv_predict_kernel,
        out_shape=jax.ShapeDtypeStruct((batch, seq, v), jnp.float32),
        grid_spec=pltpu.PrefetchScalarGridSpec(
            num_scalar_prefetch=0,
            grid=(1,),
            in_specs=[
                pl.BlockSpec((n, hh), lambda i: (0, 0)),
                pl.BlockSpec((n, hh), lambda i: (0, 0)),
                pl.BlockSpec(wc.shape, lambda i: (0, 0, 0)),
                pl.BlockSpec(bc.shape, lambda i: (0, 0)),
                pl.BlockSpec(wp.shape, lambda i: (0, 0)),
                pl.BlockSpec(bp.shape, lambda i: (0, 0)),
            ],
            out_specs=pl.BlockSpec((batch, seq, v), lambda i: (0, 0, 0)),
            scratch_shapes=[pltpu.VMEM((n, v), jnp.float32)],
        ),
        compiler_params=pltpu.CompilerParams(dimension_semantics=("arbitrary",)),
    )(xf_flat, xb_flat, wc, bc, wp, bp)


# ----------------------------------------------------------------------------
# Weight packing (done once, outside the jitted forward) + forward
# ----------------------------------------------------------------------------
def pack_params(params, hidden_dim, n_layer):
    hh = hidden_dim // 2
    emb = params["embedding"]                                         # (V, E)
    packed_lstm = []
    emb_proj0 = None
    for layer in range(n_layer):
        lp = params["lstm"][layer]
        w_cat = jnp.concatenate([lp["w_ih_f"].T, lp["w_ih_b"].T], axis=1)   # (in, 8Hh)
        bias_cat = jnp.concatenate(
            [lp["b_ih_f"] + lp["b_hh_f"], lp["b_ih_b"] + lp["b_hh_b"]])[None, :]
        z = jnp.zeros((hh, 4 * hh), jnp.float32)
        whh_bd = jnp.concatenate(
            [jnp.concatenate([lp["w_hh_f"].T, z], axis=1),
             jnp.concatenate([z, lp["w_hh_b"].T], axis=1)], axis=0)         # (2Hh, 8Hh)
        entry = {"whh_bd": whh_bd}
        if layer == 0:
            # Fold the layer-0 input projection (+ gate biases) into the table.
            emb_proj0 = emb @ w_cat + bias_cat                              # (V, 8Hh)
        else:
            entry["w_cat"] = w_cat
            entry["bias_cat"] = bias_cat
        packed_lstm.append(entry)

    return {
        "emb_proj0": emb_proj0,
        "lstm": packed_lstm,
        "conv_w": jnp.transpose(params["conv_w"], (2, 1, 0)),               # (3, H_in, H_out)
        "conv_b": params["conv_b"][None, :],                                # (1, H)
        "w_pred": params["lin_w"].T @ emb.T,                                # (H, V) folded
        "b_pred": (params["lin_b"] @ emb.T)[None, :],                       # (1, V) folded
    }


@functools.partial(jax.jit, static_argnames=("hidden_dim", "n_layer"))
def bilstm_cnn_forward(tokens, packed, *, hidden_dim, n_layer):
    """Full BiLSTMCNN.forward. tokens: (B, S) int32. Returns (B, S, V) float32."""
    hh = hidden_dim // 2
    b, s = tokens.shape

    # Embedding lookup fused with the layer-0 input projection; the gather
    # directly produces the time-major (S, B, 8*Hh) gate pre-activations.
    # (embed_dropout is identity at inference.)
    xproj = packed["emb_proj0"][tokens.T]

    hf_flat = hb_flat = None
    for layer in range(n_layer):
        lw = packed["lstm"][layer]
        if layer > 0:
            xproj = _run_proj(hf_flat, hb_flat, lw["w_cat"], lw["bias_cat"])
            xproj = xproj.reshape(s, b, 4 * hidden_dim)            # free reshape
        h_f, h_b = _run_bilstm_layer(xproj, lw["whh_bd"], hh)      # (S,B,Hh) x2
        hf_flat = h_f.reshape(s * b, hh)                           # time-major flat
        hb_flat = h_b.reshape(s * b, hh)

    return _run_conv_predict(hf_flat, hb_flat, packed["conv_w"], packed["conv_b"],
                             packed["w_pred"], packed["b_pred"], b, s)


# ----------------------------------------------------------------------------
# Pure-JAX reference (unfused math, for correctness check)
# ----------------------------------------------------------------------------
def _ref_lstm_dir(x, w_ih, w_hh, b_ih, b_hh, hh):
    b = x.shape[0]

    def step(carry, xt):
        h, c = carry
        gates = xt @ w_ih.T + h @ w_hh.T + b_ih + b_hh
        i = jax.nn.sigmoid(gates[:, :hh])
        f = jax.nn.sigmoid(gates[:, hh:2 * hh])
        g = jnp.tanh(gates[:, 2 * hh:3 * hh])
        o = jax.nn.sigmoid(gates[:, 3 * hh:])
        c = f * c + i * g
        h = o * jnp.tanh(c)
        return (h, c), h

    init = (jnp.zeros((b, hh), jnp.float32), jnp.zeros((b, hh), jnp.float32))
    _, ys = jax.lax.scan(step, init, jnp.transpose(x, (1, 0, 2)))
    return jnp.transpose(ys, (1, 0, 2))


def _ref_forward(tokens, params, hidden_dim, n_layer):
    hh = hidden_dim // 2
    emb = params["embedding"]
    h = emb[tokens]
    for layer in range(n_layer):
        lp = params["lstm"][layer]
        fwd = _ref_lstm_dir(h, lp["w_ih_f"], lp["w_hh_f"], lp["b_ih_f"], lp["b_hh_f"], hh)
        bwd = _ref_lstm_dir(h[:, ::-1], lp["w_ih_b"], lp["w_hh_b"],
                            lp["b_ih_b"], lp["b_hh_b"], hh)[:, ::-1]
        h = jnp.concatenate([fwd, bwd], axis=-1)
    s = h.shape[1]
    xp = jnp.pad(h, ((0, 0), (1, 1), (0, 0)))
    w_conv = params["conv_w"]                                        # (H, H, 3)
    conv = sum(jnp.einsum("bsc,oc->bso", xp[:, k:k + s, :], w_conv[:, :, k])
               for k in range(3)) + params["conv_b"]
    conv = jnp.maximum(conv, 0.0)
    lin = conv @ params["lin_w"].T + params["lin_b"]
    return lin @ emb.T


# ----------------------------------------------------------------------------
# Deterministic parameter init + main
# ----------------------------------------------------------------------------
def make_params(key, vocab_size, embed_dim, hidden_dim, n_layer):
    hh = hidden_dim // 2
    keys = iter(jax.random.split(key, 64))

    def rnd(shape, scale=0.1):
        return (scale * jax.random.normal(next(keys), shape)).astype(jnp.float32)

    lstm_layers = []
    for layer in range(n_layer):
        in_dim = embed_dim if layer == 0 else hidden_dim
        lstm_layers.append({
            "w_ih_f": rnd((4 * hh, in_dim)), "w_hh_f": rnd((4 * hh, hh)),
            "b_ih_f": rnd((4 * hh,)), "b_hh_f": rnd((4 * hh,)),
            "w_ih_b": rnd((4 * hh, in_dim)), "w_hh_b": rnd((4 * hh, hh)),
            "b_ih_b": rnd((4 * hh,)), "b_hh_b": rnd((4 * hh,)),
        })
    return {
        "embedding": rnd((vocab_size, embed_dim)),
        "lstm": lstm_layers,
        "conv_w": rnd((hidden_dim, hidden_dim, 3)),   # torch Conv1d weight layout
        "conv_b": rnd((hidden_dim,)),
        "lin_w": rnd((embed_dim, hidden_dim)),        # torch Linear weight layout
        "lin_b": rnd((embed_dim,)),
    }


if __name__ == "__main__":
    VOCAB, EMBED, HIDDEN, N_LAYER = 64, 16, 32, 2
    BATCH, SEQ = 2, 8

    key = jax.random.PRNGKey(0)
    k_tok, k_par = jax.random.split(key)
    tokens = jax.random.randint(k_tok, (BATCH, SEQ), 0, VOCAB, dtype=jnp.int32)
    params = make_params(k_par, VOCAB, EMBED, HIDDEN, N_LAYER)
    packed = pack_params(params, HIDDEN, N_LAYER)     # one-time weight packing

    out = bilstm_cnn_forward(tokens, packed, hidden_dim=HIDDEN, n_layer=N_LAYER)
    out = jax.block_until_ready(out)

    ref = _ref_forward(tokens, params, HIDDEN, N_LAYER)
    assert out.shape == (BATCH, SEQ, VOCAB), out.shape
    err = float(jnp.max(jnp.abs(out - ref)))
    assert jnp.allclose(out, ref, rtol=2e-3, atol=2e-3), err

    print("KERNEL_OK")
</pallas_src>

<mosaic_0001>
module attributes {stable_mosaic.version = 11 : i64} {
  func.func @_proj_kernel(%arg0: i32, %arg1: memref<16x16xf32, #tpu.memory_space<vmem>>, %arg2: memref<16x16xf32, #tpu.memory_space<vmem>>, %arg3: memref<32x128xf32, #tpu.memory_space<vmem>>, %arg4: memref<1x128xf32, #tpu.memory_space<vmem>>, %arg5: memref<16x128xf32, #tpu.memory_space<vmem>>) attributes {dimension_semantics = [#tpu.dimension_semantics<arbitrary>], iteration_bounds = array<i64: 1>, scalar_prefetch = 0 : i64, scratch_operands = 0 : i64, tpu.core_type = #tpu.core_type<tc>, window_params = [{pipeline_mode = #tpu.pipeline_mode<synchronous>, transform_indices = @transform_0, window_bounds = array<i64: 16, 16>}, {pipeline_mode = #tpu.pipeline_mode<synchronous>, transform_indices = @transform_1, window_bounds = array<i64: 16, 16>}, {pipeline_mode = #tpu.pipeline_mode<synchronous>, transform_indices = @transform_2, window_bounds = array<i64: 32, 128>}, {pipeline_mode = #tpu.pipeline_mode<synchronous>, transform_indices = @transform_3, window_bounds = array<i64: 1, 128>}, {pipeline_mode = #tpu.pipeline_mode<synchronous>, transform_indices = @transform_4, window_bounds = array<i64: 16, 128>}]} {
    %c0 = arith.constant 0 : index
    %c0_0 = arith.constant 0 : index
    %0 = vector.load %arg1[%c0, %c0_0] : memref<16x16xf32, #tpu.memory_space<vmem>>, vector<16x16xf32>
    %c0_1 = arith.constant 0 : index
    %c0_2 = arith.constant 0 : index
    %1 = vector.load %arg3[%c0_1, %c0_2] : memref<32x128xf32, #tpu.memory_space<vmem>>, vector<16x128xf32>
    %cst = arith.constant dense<0.000000e+00> : vector<16x128xf32>
    %2 = tpu.matmul %0, %1, %cst {dimension_numbers = #tpu.dot_dimension_numbers<[1], [0], [0], [1], [0, 0, 1, 1], [], []>} : vector<16x16xf32>, vector<16x128xf32>, vector<16x128xf32> -> vector<16x128xf32>
    %c0_3 = arith.constant 0 : index
    %c0_4 = arith.constant 0 : index
    %3 = vector.load %arg2[%c0_3, %c0_4] : memref<16x16xf32, #tpu.memory_space<vmem>>, vector<16x16xf32>
    %c16 = arith.constant 16 : index
    %c0_5 = arith.constant 0 : index
    %4 = vector.load %arg3[%c16, %c0_5] : memref<32x128xf32, #tpu.memory_space<vmem>>, vector<16x128xf32>
    %cst_6 = arith.constant dense<0.000000e+00> : vector<16x128xf32>
    %5 = tpu.matmul %3, %4, %cst_6 {dimension_numbers = #tpu.dot_dimension_numbers<[1], [0], [0], [1], [0, 0, 1, 1], [], []>} : vector<16x16xf32>, vector<16x128xf32>, vector<16x128xf32> -> vector<16x128xf32>
    %6 = arith.addf %2, %5 : vector<16x128xf32>
    %c0_7 = arith.constant 0 : index
    %c0_8 = arith.constant 0 : index
    %7 = vector.load %arg4[%c0_7, %c0_8] : memref<1x128xf32, #tpu.memory_space<vmem>>, vector<1x128xf32>
    %8 = vector.broadcast %7 : vector<1x128xf32> to vector<16x128xf32>
    %9 = arith.addf %6, %8 : vector<16x128xf32>
    %c0_9 = arith.constant 0 : index
    %c0_10 = arith.constant 0 : index
    %10 = vector.load %arg5[%c0_9, %c0_10] : memref<16x128xf32, #tpu.memory_space<vmem>>, vector<16x128xf32>
    tpu.vector_store %arg5[%c0_9, %c0_10], %9 {strides = array<i32>} : memref<16x128xf32, #tpu.memory_space<vmem>>, vector<16x128xf32>,
    return
  }
  func.func @transform_0(%arg0: i32) -> (i32, i32) {
    %c0_i32 = arith.constant 0 : i32
    %c0_i32_0 = arith.constant 0 : i32
    %c0_i32_1 = arith.constant 0 : i32
    return %c0_i32, %c0_i32_0 : i32, i32
  }
  func.func @transform_1(%arg0: i32) -> (i32, i32) {
    %c0_i32 = arith.constant 0 : i32
    %c0_i32_0 = arith.constant 0 : i32
    %c0_i32_1 = arith.constant 0 : i32
    return %c0_i32, %c0_i32_0 : i32, i32
  }
  func.func @transform_2(%arg0: i32) -> (i32, i32) {
    %c0_i32 = arith.constant 0 : i32
    %c0_i32_0 = arith.constant 0 : i32
    %c0_i32_1 = arith.constant 0 : i32
    return %c0_i32, %c0_i32_0 : i32, i32
  }
  func.func @transform_3(%arg0: i32) -> (i32, i32) {
    %c0_i32 = arith.constant 0 : i32
    %c0_i32_0 = arith.constant 0 : i32
    %c0_i32_1 = arith.constant 0 : i32
    return %c0_i32, %c0_i32_0 : i32, i32
  }
  func.func @transform_4(%arg0: i32) -> (i32, i32) {
    %c0_i32 = arith.constant 0 : i32
    %c0_i32_0 = arith.constant 0 : i32
    %c0_i32_1 = arith.constant 0 : i32
    return %c0_i32, %c0_i32_0 : i32, i32
  }
}

module attributes {stable_mosaic.version = 11 : i64} {
  func.func @_bilstm_kernel(%arg0: i32, %arg1: memref<1x2x128xf32, #tpu.memory_space<vmem>>, %arg2: memref<1x2x128xf32, #tpu.memory_space<vmem>>, %arg3: memref<32x128xf32, #tpu.memory_space<vmem>>, %arg4: memref<1x2x16xf32, #tpu.memory_space<vmem>>, %arg5: memref<1x2x16xf32, #tpu.memory_space<vmem>>, %arg6: memref<2x32xf32, #tpu.memory_space<vmem>>, %arg7: memref<2x32xf32, #tpu.memory_space<vmem>>) attributes {dimension_semantics = [#tpu.dimension_semantics<arbitrary>], iteration_bounds = array<i64: 8>, scalar_prefetch = 0 : i64, scratch_operands = 2 : i64, tpu.core_type = #tpu.core_type<tc>, window_params = [{transform_indices = @transform_0, window_bounds = array<i64: 1, 2, 128>}, {transform_indices = @transform_1, window_bounds = array<i64: 1, 2, 128>}, {pipeline_mode = #tpu.pipeline_mode<synchronous>, transform_indices = @transform_2, window_bounds = array<i64: 32, 128>}, {transform_indices = @transform_3, window_bounds = array<i64: 1, 2, 16>}, {transform_indices = @transform_4, window_bounds = array<i64: 1, 2, 16>}]} {
    %c0_i32 = arith.constant 0 : i32
    %0 = arith.cmpi eq, %arg0, %c0_i32 : i32
    %1 = arith.extui %0 : i1 to i32
    %c0_i32_0 = arith.constant 0 : i32
    %2 = arith.cmpi ne, %1, %c0_i32_0 : i32
    scf.if %2 {
      %cst_28 = arith.constant 0.000000e+00 : f32
      %79 = vector.broadcast %cst_28 : f32 to vector<2x32xf32>
      %c0_29 = arith.constant 0 : index
      %c0_30 = arith.constant 0 : index
      %80 = vector.load %arg6[%c0_29, %c0_30] : memref<2x32xf32, #tpu.memory_space<vmem>>, vector<2x32xf32>
      tpu.vector_store %arg6[%c0_29, %c0_30], %79 {strides = array<i32>} : memref<2x32xf32, #tpu.memory_space<vmem>>, vector<2x32xf32>,
      %cst_31 = arith.constant 0.000000e+00 : f32
      %81 = vector.broadcast %cst_31 : f32 to vector<2x32xf32>
      %c0_32 = arith.constant 0 : index
      %c0_33 = arith.constant 0 : index
      %82 = vector.load %arg7[%c0_32, %c0_33] : memref<2x32xf32, #tpu.memory_space<vmem>>, vector<2x32xf32>
      tpu.vector_store %arg7[%c0_32, %c0_33], %81 {strides = array<i32>} : memref<2x32xf32, #tpu.memory_space<vmem>>, vector<2x32xf32>,
    } else {
    }
    %c0 = arith.constant 0 : index
    %c0_1 = arith.constant 0 : index
    %3 = vector.load %arg6[%c0, %c0_1] : memref<2x32xf32, #tpu.memory_space<vmem>>, vector<2x32xf32>
    %c0_2 = arith.constant 0 : index
    %c0_3 = arith.constant 0 : index
    %4 = vector.load %arg3[%c0_2, %c0_3] : memref<32x128xf32, #tpu.memory_space<vmem>>, vector<32x128xf32>
    %cst = arith.constant dense<0.000000e+00> : vector<2x128xf32>
    %5 = tpu.matmul %3, %4, %cst {dimension_numbers = #tpu.dot_dimension_numbers<[1], [0], [0], [1], [0, 0, 1, 1], [], []>} : vector<2x32xf32>, vector<32x128xf32>, vector<2x128xf32> -> vector<2x128xf32>
    %c0_4 = arith.constant 0 : index
    %c0_5 = arith.constant 0 : index
    %c0_6 = arith.constant 0 : index
    %6 = vector.load %arg1[%c0_4, %c0_5, %c0_6] : memref<1x2x128xf32, #tpu.memory_space<vmem>>, vector<1x2x128xf32>
    %7 = vector.shape_cast %6 : vector<1x2x128xf32> to vector<2x128xf32>
    %8 = vector.extract_strided_slice %7 {offsets = [0, 0], sizes = [2, 64], strides = [1, 1]} : vector<2x128xf32> to vector<2x64xf32>
    %9 = vector.extract_strided_slice %5 {offsets = [0, 0], sizes = [2, 64], strides = [1, 1]} : vector<2x128xf32> to vector<2x64xf32>
    %10 = arith.addf %8, %9 : vector<2x64xf32>
    %c0_7 = arith.constant 0 : index
    %c0_8 = arith.constant 0 : index
    %c0_9 = arith.constant 0 : index
    %11 = vector.load %arg2[%c0_7, %c0_8, %c0_9] : memref<1x2x128xf32, #tpu.memory_space<vmem>>, vector<1x2x128xf32>
    %12 = vector.shape_cast %11 : vector<1x2x128xf32> to vector<2x128xf32>
    %13 = vector.extract_strided_slice %12 {offsets = [0, 64], sizes = [2, 64], strides = [1, 1]} : vector<2x128xf32> to vector<2x64xf32>
    %14 = vector.extract_strided_slice %5 {offsets = [0, 64], sizes = [2, 64], strides = [1, 1]} : vector<2x128xf32> to vector<2x64xf32>
    %15 = arith.addf %13, %14 : vector<2x64xf32>
    %c0_10 = arith.constant 0 : index
    %c0_11 = arith.constant 0 : index
    %16 = vector.load %arg7[%c0_10, %c0_11] : memref<2x32xf32, #tpu.memory_space<vmem>>, vector<2x32xf32>
    %17 = vector.extract_strided_slice %16 {offsets = [0, 0], sizes = [2, 16], strides = [1, 1]} : vector<2x32xf32> to vector<2x16xf32>
    %18 = vector.extract_strided_slice %10 {offsets = [0, 0], sizes = [2, 16], strides = [1, 1]} : vector<2x64xf32> to vector<2x16xf32>
    %19 = arith.negf %18 : vector<2x16xf32>
    %20 = math.exp %19 : vector<2x16xf32>
    %cst_12 = arith.constant 1.000000e+00 : f32
    %21 = vector.broadcast %cst_12 : f32 to vector<2x16xf32>
    %22 = arith.addf %21, %20 : vector<2x16xf32>
    %23 = arith.divf %21, %22 : vector<2x16xf32>
    %24 = vector.extract_strided_slice %10 {offsets = [0, 16], sizes = [2, 16], strides = [1, 1]} : vector<2x64xf32> to vector<2x16xf32>
    %25 = arith.negf %24 : vector<2x16xf32>
    %26 = math.exp %25 : vector<2x16xf32>
    %cst_13 = arith.constant 1.000000e+00 : f32
    %27 = vector.broadcast %cst_13 : f32 to vector<2x16xf32>
    %28 = arith.addf %27, %26 : vector<2x16xf32>
    %29 = arith.divf %27, %28 : vector<2x16xf32>
    %30 = vector.extract_strided_slice %10 {offsets = [0, 32], sizes = [2, 16], strides = [1, 1]} : vector<2x64xf32> to vector<2x16xf32>
    %31 = math.tanh %30 : vector<2x16xf32>
    %32 = vector.extract_strided_slice %10 {offsets = [0, 48], sizes = [2, 16], strides = [1, 1]} : vector<2x64xf32> to vector<2x16xf32>
    %33 = arith.negf %32 : vector<2x16xf32>
    %34 = math.exp %33 : vector<2x16xf32>
    %cst_14 = arith.constant 1.000000e+00 : f32
    %35 = vector.broadcast %cst_14 : f32 to vector<2x16xf32>
    %36 = arith.addf %35, %34 : vector<2x16xf32>
    %37 = arith.divf %35, %36 : vector<2x16xf32>
    %38 = arith.mulf %29, %17 : vector<2x16xf32>
    %39 = arith.mulf %23, %31 : vector<2x16xf32>
    %40 = arith.addf %38, %39 : vector<2x16xf32>
    %41 = math.tanh %40 : vector<2x16xf32>
    %42 = arith.mulf %37, %41 : vector<2x16xf32>
    %43 = vector.extract_strided_slice %16 {offsets = [0, 16], sizes = [2, 16], strides = [1, 1]} : vector<2x32xf32> to vector<2x16xf32>
    %44 = vector.extract_strided_slice %15 {offsets = [0, 0], sizes = [2, 16], strides = [1, 1]} : vector<2x64xf32> to vector<2x16xf32>
    %45 = arith.negf %44 : vector<2x16xf32>
    %46 = math.exp %45 : vector<2x16xf32>
    %cst_15 = arith.constant 1.000000e+00 : f32
    %47 = vector.broadcast %cst_15 : f32 to vector<2x16xf32>
    %48 = arith.addf %47, %46 : vector<2x16xf32>
    %49 = arith.divf %47, %48 : vector<2x16xf32>
    %50 = vector.extract_strided_slice %15 {offsets = [0, 16], sizes = [2, 16], strides = [1, 1]} : vector<2x64xf32> to vector<2x16xf32>
    %51 = arith.negf %50 : vector<2x16xf32>
    %52 = math.exp %51 : vector<2x16xf32>
    %cst_16 = arith.constant 1.000000e+00 : f32
    %53 = vector.broadcast %cst_16 : f32 to vector<2x16xf32>
    %54 = arith.addf %53, %52 : vector<2x16xf32>
    %55 = arith.divf %53, %54 : vector<2x16xf32>
    %56 = vector.extract_strided_slice %15 {offsets = [0, 32], sizes = [2, 16], strides = [1, 1]} : vector<2x64xf32> to vector<2x16xf32>
    %57 = math.tanh %56 : vector<2x16xf32>
    %58 = vector.extract_strided_slice %15 {offsets = [0, 48], sizes = [2, 16], strides = [1, 1]} : vector<2x64xf32> to vector<2x16xf32>
    %59 = arith.negf %58 : vector<2x16xf32>
    %60 = math.exp %59 : vector<2x16xf32>
    %cst_17 = arith.constant 1.000000e+00 : f32
    %61 = vector.broadcast %cst_17 : f32 to vector<2x16xf32>
    %62 = arith.addf %61, %60 : vector<2x16xf32>
    %63 = arith.divf %61, %62 : vector<2x16xf32>
    %64 = arith.mulf %55, %43 : vector<2x16xf32>
    %65 = arith.mulf %49, %57 : vector<2x16xf32>
    %66 = arith.addf %64, %65 : vector<2x16xf32>
    %67 = math.tanh %66 : vector<2x16xf32>
    %68 = arith.mulf %63, %67 : vector<2x16xf32>
    %69 = tpu.concatenate %42, %68 in 1 : vector<2x16xf32>, vector<2x16xf32> -> vector<2x32xf32>
    %c0_18 = arith.constant 0 : index
    %c0_19 = arith.constant 0 : index
    %70 = vector.load %arg6[%c0_18, %c0_19] : memref<2x32xf32, #tpu.memory_space<vmem>>, vector<2x32xf32>
    tpu.vector_store %arg6[%c0_18, %c0_19], %69 {strides = array<i32>} : memref<2x32xf32, #tpu.memory_space<vmem>>, vector<2x32xf32>,
    %71 = tpu.concatenate %40, %66 in 1 : vector<2x16xf32>, vector<2x16xf32> -> vector<2x32xf32>
    %c0_20 = arith.constant 0 : index
    %c0_21 = arith.constant 0 : index
    %72 = vector.load %arg7[%c0_20, %c0_21] : memref<2x32xf32, #tpu.memory_space<vmem>>, vector<2x32xf32>
    tpu.vector_store %arg7[%c0_20, %c0_21], %71 {strides = array<i32>} : memref<2x32xf32, #tpu.memory_space<vmem>>, vector<2x32xf32>,
    %c0_22 = arith.constant 0 : index
    %c0_23 = arith.constant 0 : index
    %c0_24 = arith.constant 0 : index
    %73 = vector.load %arg4[%c0_22, %c0_23, %c0_24] : memref<1x2x16xf32, #tpu.memory_space<vmem>>, vector<1x2x16xf32>
    %74 = vector.shape_cast %73 : vector<1x2x16xf32> to vector<2x16xf32>
    %75 = vector.shape_cast %42 : vector<2x16xf32> to vector<1x2x16xf32>
    tpu.vector_store %arg4[%c0_22, %c0_23, %c0_24], %75 {strides = array<i32>} : memref<1x2x16xf32, #tpu.memory_space<vmem>>, vector<1x2x16xf32>,
    %c0_25 = arith.constant 0 : index
    %c0_26 = arith.constant 0 : index
    %c0_27 = arith.constant 0 : index
    %76 = vector.load %arg5[%c0_25, %c0_26, %c0_27] : memref<1x2x16xf32, #tpu.memory_space<vmem>>, vector<1x2x16xf32>
    %77 = vector.shape_cast %76 : vector<1x2x16xf32> to vector<2x16xf32>
    %78 = vector.shape_cast %68 : vector<2x16xf32> to vector<1x2x16xf32>
    tpu.vector_store %arg5[%c0_25, %c0_26, %c0_27], %78 {strides = array<i32>} : memref<1x2x16xf32, #tpu.memory_space<vmem>>, vector<1x2x16xf32>,
    return
  }
  func.func @transform_0(%arg0: i32) -> (i32, i32, i32) {
    %c0_i32 = arith.constant 0 : i32
    %c0_i32_0 = arith.constant 0 : i32
    %c0_i32_1 = arith.constant 0 : i32
    return %arg0, %c0_i32, %c0_i32_0 : i32, i32, i32
  }
  func.func @transform_1(%arg0: i32) -> (i32, i32, i32) {
    %c7_i32 = arith.constant 7 : i32
    %0 = arith.subi %c7_i32, %arg0 : i32
    %c0_i32 = arith.constant 0 : i32
    %c0_i32_0 = arith.constant 0 : i32
    %c0_i32_1 = arith.constant 0 : i32
    return %0, %c0_i32, %c0_i32_0 : i32, i32, i32
  }
  func.func @transform_2(%arg0: i32) -> (i32, i32) {
    %c0_i32 = arith.constant 0 : i32
    %c0_i32_0 = arith.constant 0 : i32
    %c0_i32_1 = arith.constant 0 : i32
    return %c0_i32, %c0_i32_0 : i32, i32
  }
  func.func @transform_3(%arg0: i32) -> (i32, i32, i32) {
    %c0_i32 = arith.constant 0 : i32
    %c0_i32_0 = arith.constant 0 : i32
    %c0_i32_1 = arith.constant 0 : i32
    return %arg0, %c0_i32, %c0_i32_0 : i32, i32, i32
  }
  func.func @transform_4(%arg0: i32) -> (i32, i32, i32) {
    %c7_i32 = arith.constant 7 : i32
    %0 = arith.subi %c7_i32, %arg0 : i32
    %c0_i32 = arith.constant 0 : i32
    %c0_i32_0 = arith.constant 0 : i32
    %c0_i32_1 = arith.constant 0 : i32
    return %0, %c0_i32, %c0_i32_0 : i32, i32, i32
  }
}

module attributes {stable_mosaic.version = 11 : i64} {
  func.func @_conv_predict_kernel(%arg0: i32, %arg1: memref<16x16xf32, #tpu.memory_space<vmem>>, %arg2: memref<16x16xf32, #tpu.memory_space<vmem>>, %arg3: memref<3x32x32xf32, #tpu.memory_space<vmem>>, %arg4: memref<1x32xf32, #tpu.memory_space<vmem>>, %arg5: memref<32x64xf32, #tpu.memory_space<vmem>>, %arg6: memref<1x64xf32, #tpu.memory_space<vmem>>, %arg7: memref<2x8x64xf32, #tpu.memory_space<vmem>>, %arg8: memref<16x64xf32, #tpu.memory_space<vmem>>) attributes {dimension_semantics = [#tpu.dimension_semantics<arbitrary>], iteration_bounds = array<i64: 1>, scalar_prefetch = 0 : i64, scratch_operands = 1 : i64, tpu.core_type = #tpu.core_type<tc>, window_params = [{pipeline_mode = #tpu.pipeline_mode<synchronous>, transform_indices = @transform_0, window_bounds = array<i64: 16, 16>}, {pipeline_mode = #tpu.pipeline_mode<synchronous>, transform_indices = @transform_1, window_bounds = array<i64: 16, 16>}, {pipeline_mode = #tpu.pipeline_mode<synchronous>, transform_indices = @transform_2, window_bounds = array<i64: 3, 32, 32>}, {pipeline_mode = #tpu.pipeline_mode<synchronous>, transform_indices = @transform_3, window_bounds = array<i64: 1, 32>}, {pipeline_mode = #tpu.pipeline_mode<synchronous>, transform_indices = @transform_4, window_bounds = array<i64: 32, 64>}, {pipeline_mode = #tpu.pipeline_mode<synchronous>, transform_indices = @transform_5, window_bounds = array<i64: 1, 64>}, {pipeline_mode = #tpu.pipeline_mode<synchronous>, transform_indices = @transform_6, window_bounds = array<i64: 2, 8, 64>}]} {
    %c0 = arith.constant 0 : index
    %c0_0 = arith.constant 0 : index
    %0 = vector.load %arg1[%c0, %c0_0] : memref<16x16xf32, #tpu.memory_space<vmem>>, vector<16x16xf32>
    %c0_1 = arith.constant 0 : index
    %c0_2 = arith.constant 0 : index
    %1 = vector.load %arg2[%c0_1, %c0_2] : memref<16x16xf32, #tpu.memory_space<vmem>>, vector<16x16xf32>
    %2 = tpu.concatenate %0, %1 in 1 : vector<16x16xf32>, vector<16x16xf32> -> vector<16x32xf32>
    %c0_3 = arith.constant 0 : index
    %c0_4 = arith.constant 0 : index
    %c0_5 = arith.constant 0 : index
    %3 = vector.load %arg3[%c0_3, %c0_4, %c0_5] : memref<3x32x32xf32, #tpu.memory_space<vmem>>, vector<1x32x32xf32>
    %4 = vector.shape_cast %3 : vector<1x32x32xf32> to vector<32x32xf32>
    %cst = arith.constant dense<0.000000e+00> : vector<16x32xf32>
    %5 = tpu.matmul %2, %4, %cst {dimension_numbers = #tpu.dot_dimension_numbers<[1], [0], [0], [1], [0, 0, 1, 1], [], []>} : vector<16x32xf32>, vector<32x32xf32>, vector<16x32xf32> -> vector<16x32xf32>
    %c1 = arith.constant 1 : index
    %c0_6 = arith.constant 0 : index
    %c0_7 = arith.constant 0 : index
    %6 = vector.load %arg3[%c1, %c0_6, %c0_7] : memref<3x32x32xf32, #tpu.memory_space<vmem>>, vector<1x32x32xf32>
    %7 = vector.shape_cast %6 : vector<1x32x32xf32> to vector<32x32xf32>
    %cst_8 = arith.constant dense<0.000000e+00> : vector<16x32xf32>
    %8 = tpu.matmul %2, %7, %cst_8 {dimension_numbers = #tpu.dot_dimension_numbers<[1], [0], [0], [1], [0, 0, 1, 1], [], []>} : vector<16x32xf32>, vector<32x32xf32>, vector<16x32xf32> -> vector<16x32xf32>
    %c2 = arith.constant 2 : index
    %c0_9 = arith.constant 0 : index
    %c0_10 = arith.constant 0 : index
    %9 = vector.load %arg3[%c2, %c0_9, %c0_10] : memref<3x32x32xf32, #tpu.memory_space<vmem>>, vector<1x32x32xf32>
    %10 = vector.shape_cast %9 : vector<1x32x32xf32> to vector<32x32xf32>
    %cst_11 = arith.constant dense<0.000000e+00> : vector<16x32xf32>
    %11 = tpu.matmul %2, %10, %cst_11 {dimension_numbers = #tpu.dot_dimension_numbers<[1], [0], [0], [1], [0, 0, 1, 1], [], []>} : vector<16x32xf32>, vector<32x32xf32>, vector<16x32xf32> -> vector<16x32xf32>
    %cst_12 = arith.constant 0.000000e+00 : f32
    %12 = vector.broadcast %cst_12 : f32 to vector<2x32xf32>
    %13 = vector.extract_strided_slice %5 {offsets = [0, 0], sizes = [14, 32], strides = [1, 1]} : vector<16x32xf32> to vector<14x32xf32>
    %14 = tpu.concatenate %12, %13 in 0 : vector<2x32xf32>, vector<14x32xf32> -> vector<16x32xf32>
    %15 = arith.addf %8, %14 : vector<16x32xf32>
    %16 = vector.extract_strided_slice %11 {offsets = [2, 0], sizes = [14, 32], strides = [1, 1]} : vector<16x32xf32> to vector<14x32xf32>
    %17 = tpu.concatenate %16, %12 in 0 : vector<14x32xf32>, vector<2x32xf32> -> vector<16x32xf32>
    %18 = arith.addf %15, %17 : vector<16x32xf32>
    %c0_13 = arith.constant 0 : index
    %c0_14 = arith.constant 0 : index
    %19 = vector.load %arg4[%c0_13, %c0_14] : memref<1x32xf32, #tpu.memory_space<vmem>>, vector<1x32xf32>
    %20 = vector.broadcast %19 : vector<1x32xf32> to vector<16x32xf32>
    %21 = arith.addf %18, %20 : vector<16x32xf32>
    %cst_15 = arith.constant 0.000000e+00 : f32
    %22 = vector.broadcast %cst_15 : f32 to vector<16x32xf32>
    %23 = arith.maximumf %21, %22 : vector<16x32xf32>
    %c0_16 = arith.constant 0 : index
    %c0_17 = arith.constant 0 : index
    %24 = vector.load %arg5[%c0_16, %c0_17] : memref<32x64xf32, #tpu.memory_space<vmem>>, vector<32x64xf32>
    %cst_18 = arith.constant dense<0.000000e+00> : vector<16x64xf32>
    %25 = tpu.matmul %23, %24, %cst_18 {dimension_numbers = #tpu.dot_dimension_numbers<[1], [0], [0], [1], [0, 0, 1, 1], [], []>} : vector<16x32xf32>, vector<32x64xf32>, vector<16x64xf32> -> vector<16x64xf32>
    %c0_19 = arith.constant 0 : index
    %c0_20 = arith.constant 0 : index
    %26 = vector.load %arg6[%c0_19, %c0_20] : memref<1x64xf32, #tpu.memory_space<vmem>>, vector<1x64xf32>
    %27 = vector.broadcast %26 : vector<1x64xf32> to vector<16x64xf32>
    %28 = arith.addf %25, %27 : vector<16x64xf32>
    %c0_21 = arith.constant 0 : index
    %c0_22 = arith.constant 0 : index
    %29 = vector.load %arg8[%c0_21, %c0_22] : memref<16x64xf32, #tpu.memory_space<vmem>>, vector<16x64xf32>
    tpu.vector_store %arg8[%c0_21, %c0_22], %28 {strides = array<i32>} : memref<16x64xf32, #tpu.memory_space<vmem>>, vector<16x64xf32>,
    %c0_23 = arith.constant 0 : index
    %c0_24 = arith.constant 0 : index
    %30 = tpu.strided_load %arg8[%c0_23, %c0_24] {strides = array<i32: 2, 1>} : memref<16x64xf32, #tpu.memory_space<vmem>>, vector<8x64xf32>
    %c0_25 = arith.constant 0 : index
    %c0_26 = arith.constant 0 : index
    %c0_27 = arith.constant 0 : index
    %31 = vector.load %arg7[%c0_25, %c0_26, %c0_27] : memref<2x8x64xf32, #tpu.memory_space<vmem>>, vector<1x8x64xf32>
    %32 = vector.shape_cast %31 : vector<1x8x64xf32> to vector<8x64xf32>
    %33 = vector.shape_cast %30 : vector<8x64xf32> to vector<1x8x64xf32>
    tpu.vector_store %arg7[%c0_25, %c0_26, %c0_27], %33 {strides = array<i32>} : memref<2x8x64xf32, #tpu.memory_space<vmem>>, vector<1x8x64xf32>,
    %c1_28 = arith.constant 1 : index
    %c0_29 = arith.constant 0 : index
    %34 = tpu.strided_load %arg8[%c1_28, %c0_29] {strides = array<i32: 2, 1>} : memref<16x64xf32, #tpu.memory_space<vmem>>, vector<8x64xf32>
    %c1_30 = arith.constant 1 : index
    %c0_31 = arith.constant 0 : index
    %c0_32 = arith.constant 0 : index
    %35 = vector.load %arg7[%c1_30, %c0_31, %c0_32] : memref<2x8x64xf32, #tpu.memory_space<vmem>>, vector<1x8x64xf32>
    %36 = vector.shape_cast %35 : vector<1x8x64xf32> to vector<8x64xf32>
    %37 = vector.shape_cast %34 : vector<8x64xf32> to vector<1x8x64xf32>
    tpu.vector_store %arg7[%c1_30, %c0_31, %c0_32], %37 {strides = array<i32>} : memref<2x8x64xf32, #tpu.memory_space<vmem>>, vector<1x8x64xf32>,
    return
  }
  func.func @transform_0(%arg0: i32) -> (i32, i32) {
    %c0_i32 = arith.constant 0 : i32
    %c0_i32_0 = arith.constant 0 : i32
    %c0_i32_1 = arith.constant 0 : i32
    return %c0_i32, %c0_i32_0 : i32, i32
  }
  func.func @transform_1(%arg0: i32) -> (i32, i32) {
    %c0_i32 = arith.constant 0 : i32
    %c0_i32_0 = arith.constant 0 : i32
    %c0_i32_1 = arith.constant 0 : i32
    return %c0_i32, %c0_i32_0 : i32, i32
  }
  func.func @transform_2(%arg0: i32) -> (i32, i32, i32) {
    %c0_i32 = arith.constant 0 : i32
    %c0_i32_0 = arith.constant 0 : i32
    %c0_i32_1 = arith.constant 0 : i32
    %c0_i32_2 = arith.constant 0 : i32
    return %c0_i32, %c0_i32_0, %c0_i32_1 : i32, i32, i32
  }
  func.func @transform_3(%arg0: i32) -> (i32, i32) {
    %c0_i32 = arith.constant 0 : i32
    %c0_i32_0 = arith.constant 0 : i32
    %c0_i32_1 = arith.constant 0 : i32
    return %c0_i32, %c0_i32_0 : i32, i32
  }
  func.func @transform_4(%arg0: i32) -> (i32, i32) {
    %c0_i32 = arith.constant 0 : i32
    %c0_i32_0 = arith.constant 0 : i32
    %c0_i32_1 = arith.constant 0 : i32
    return %c0_i32, %c0_i32_0 : i32, i32
  }
  func.func @transform_5(%arg0: i32) -> (i32, i32) {
    %c0_i32 = arith.constant 0 : i32
    %c0_i32_0 = arith.constant 0 : i32
    %c0_i32_1 = arith.constant 0 : i32
    return %c0_i32, %c0_i32_0 : i32, i32
  }
  func.func @transform_6(%arg0: i32) -> (i32, i32, i32) {
    %c0_i32 = arith.constant 0 : i32
    %c0_i32_0 = arith.constant 0 : i32
    %c0_i32_1 = arith.constant 0 : i32
    %c0_i32_2 = arith.constant 0 : i32
    return %c0_i32, %c0_i32_0, %c0_i32_1 : i32, i32, i32
  }
}

</mosaic_0001>

<bundles_post_ra>
// kernel: bilstm_cnn_forward.5
= control target key start
LH: loop header
LB: loop body
LE: loop exit
PB: predicated region body
PF: predicated region fallthrough
CT: control target
= control target key end

     0   :  { %vm25_vm0 = vcmask 130048   ;;  %s288_s2 = inlined_call_operand.vmem [shape: f32[32,128], index: 2, kind: input, shape index: {}]   ;;  %s289_s1 = inlined_call_operand.vmem [shape: f32[16,16], index: 1, kind: input, shape index: {}]   ;;  %s290_s0 = inlined_call_operand.vmem [shape: f32[16,16], index: 0, kind: input, shape index: {}]   ;;  %s291_s3 = inlined_call_operand.vmem [shape: f32[1,128], index: 3, kind: input, shape index: {}]   ;;  %s292_s4 = inlined_call_operand.vmem [shape: f32[16,128], index: 4, kind: output, shape index: {}]  }
   0x1   :  { %v24_v0 = vld [vmem:[%s288_s2 + $0x18] sm:$0xff]  ;;  %v20_v1 = vld [vmem:[%s288_s2 + $0x8] sm:$0xff]  ;;  %v23_v2 = vld [vmem:[%s288_s2 + $0x10] sm:$0xff] }
   0x2   :  { %216 = vmatprep.subr.mxu0 %v24_v0  ;;  %223 = vmatprep.subr.mxu1 %v20_v1  ;;  %v19_v3 = vld [vmem:[%s288_s2] sm:$0xff]  ;;  %v22_v6 = vld [vmem:[%s289_s1 + $0x8] sm:$0xff] }
   0x3   :  { %v21_v4 = vld [vmem:[%s289_s1] sm:$0xff]  ;;  %217 = vmatpush3.msra.mxu0 %v24_v0  ;;  %224 = vmatpush3.msra.mxu1 %v20_v1  ;;  %v18_v7 = vld [vmem:[%s290_s0 + $0x8] sm:$0xff] }
   0x4   :  { %v17_v5 = vld [vmem:[%s290_s0] sm:$0xff]  ;;  %218 = vmatprep.subr.mxu0 %v23_v2  ;;  %225 = vmatprep.subr.mxu1 %v19_v3 }
   0x5   :  { %219 = vmatpush3.msra.mxu0 %v23_v2  ;;  %220 = vmatprep.mubr.msk.f32.mxu0 %vm25_vm0, %v21_v4  ;;  %v207_v10 = vld [vmem:[%s291_s3] ss:$0 sm:$0xff] }
   0x6   :  { %226 = vmatpush3.msra.mxu1 %v19_v3  ;;  %227 = vmatprep.mubr.msk.f32.mxu1 %vm25_vm0, %v17_v5 }
   0x7   :  { %221 = vmatmul.mubr.msk.f32.vlgmr.msra.gmra.mxu0 %vm25_vm0, %v22_v6  ;;  %228 = vmatmul.mubr.msk.f32.vlgmr.msra.gmra.mxu1 %vm25_vm0, %v18_v7 }
  0xc7   :  { %v222_v8 = vpop.f32.mrf.mxu0  ;;  %v229_v9 = vpop.f32.mrf.mxu1 }
  0xc8   :  { %v185_v11 = vadd.f32 %v229_v9, %v222_v8 }
  0xc9   :  { %v98_v12 = vpop.f32.mrf.mxu0  ;;  %v179_v13 = vpop.f32.mrf.mxu1 }
  0xca   :  { %v196_v14 = vadd.f32 %v207_v10, %v185_v11  ;;  %v180_v15 = vadd.f32 %v179_v13, %v98_v12 }
  0xcc   :  { %198 = vst [vmem:[%s292_s4 + $0x8] sm:$0xff] %v196_v14  ;;  %v195_v16 = vadd.f32 %v207_v10, %v180_v15 }
  0xce   :  { %197 = vst [vmem:[%s292_s4] sm:$0xff] %v195_v16 }

// kernel: bilstm_cnn_forward.4
= control target key start
LH: loop header
LB: loop body
LE: loop exit
PB: predicated region body
PF: predicated region fallthrough
CT: control target
= control target key end

     0   :  { %s612_s15 = smov 0   ;;  %s665_s0 = inlined_call_operand.vmem [shape: f32[8,2,128], index: 0, kind: input, shape index: {}, may-alias: {0,1}]   ;;  %s666_s1 = inlined_call_operand.vmem [shape: f32[8,2,128], index: 1, kind: input, shape index: {}, may-alias: {0,1}]   ;;  %s667_s2 = inlined_call_operand.vmem [shape: f32[32,128], index: 2, kind: input, shape index: {}]   ;;  %s668_s3 = inlined_call_operand.vmem [shape: f32[8,2,16], index: 3, kind: output, shape index: {0}]   ;;  %s669_s4 = inlined_call_operand.vmem [shape: f32[8,2,16], index: 4, kind: output, shape index: {1}]  }
   0x1 LB: > { %s506_s16 = sadd.s32 4294967295, %s576_s15   ;;  %p510_p0 = scmp.ge.s32.totalorder %s576_s15, 1  ;;  %s576_s15 = sphi %s612_s15, %s15_s15  }
   0x2   : > { %p179_p1 = scmp.lt.s32.totalorder %s576_s15, 9 }
   0x4   : > { %p180_p2 = pnand %p510_p0, %p179_p1 }
   0x5   : > { %p213_p3 = scmp.lt.s32.totalorder (!%p180_p2), %s506_s16, 7  ;;  %s217_s17 = ssub.s32 (!%p180_p2), 7, %s506_s16 }
   0x6   : > { %183 = sbr.rel (%p180_p2) target bundleno = 727 (0x2d7), region = 32  ;;  %p218_p4 = scmp.lt.s32.totalorder (!%p180_p2), %s217_s17, 7 }
   0x7   : > { %p515_p5 = scmp.ne.s32.totalorder (!%p180_p2), %s506_s16, 0 }
   0xb   : > { %s214_s18 = scalar_select %p213_p3, %s506_s16, 7 }
   0xc   : > { %s671_s17 = smov (!%p218_p4, %s217_s17), 7  ;;  %236 = sbr.rel (%p515_p5) target bundleno = 19 (0x13), region = 36 }
   0xd   : > { %s511_s19 = sshll.u32 %s214_s18, 1  ;;  %s512_s23 = sshll.u32 %s671_s17, 1 }
   0xe   : > { %s623_s22 = scalar_lea.vmem %s665_s0, %s511_s19  ;;  %s628_s26 = scalar_lea.vmem %s666_s1, %s512_s23 }
   0xf   : > { %s633_s29 = scalar_lea.vmem %s668_s3, %s511_s19  ;;  %s638_s6 = scalar_lea.vmem %s669_s4, %s512_s23 }
  0x11   : > { %vm237_vm0 = vcmask 254976   ;;  %v578_v0 = vmov 0.0  }
  0x12   : > { %238 = vst.msk [vmem:[#allocation2] sm:$0x3] %vm237_vm0, %v578_v0  ;;  %239 = vst.msk [vmem:[#allocation3] sm:$0x3] %vm237_vm0, %v578_v0 }
  0x13 PF: > { %v244_v1 = vld [vmem:[%s667_s2 + $0x18] sm:$0xff]  ;;  %v579_v2 = vmov 0.0   ;;  %v243_v3 = vld [vmem:[%s667_s2 + $0x10] sm:$0xff]  ;;  %vm580_vm1 = vmmov 0   ;;  %s581_s11 = smov 16   ;;  %v242_v5 = vld [vmem:[%s667_s2 + $0x8] sm:$0xff] }
  0x14   : > { %526 = vmatprep.subr.mxu0 %v579_v2  ;;  %534 = vmatprep.mubr.msk.f32.mxu0 %vm580_vm1, %v579_v2  ;;  %v241_v6 = vld [vmem:[%s667_s2] sm:$0xff]  ;;  %vm245_vm2 = vcmask 261120   ;;  %s582_s17 = smov 64   ;;  %s583_s18 = smov 96   ;;  %vm401_vm3 = vcmask 123904   ;;  %vm387_vm4 = vcmask 130048  }
  0x15   : > { %527 = vmatpush3.msra.mxu0 %v244_v1  ;;  %v319_v8 = vld [vmem:[%s623_s22] sm:$0x3]  ;;  %s584_s19 = smov 32   ;;  %s585_s20 = smov 112   ;;  %vm389_vm5 = vcmask 254976  }
  0x16   : > { %528 = vmatprep.subr.mxu0 %v579_v2  ;;  %v321_v10 = vld [vmem:[%s628_s26] sm:$0x3]  ;;  %s586_s21 = smov 80  }
  0x17   : > { %529 = vmatpush3.msra.mxu0 %v243_v3 }
  0x18   : > { %530 = vmatprep.subr.mxu0 %v579_v2 }
  0x19   : > { %v323_v4 = vld [vmem:[#allocation3] sm:$0x3]  ;;  %531 = vmatpush3.msra.mxu0 %v242_v5  ;;  %v240_v7 = vld [vmem:[#allocation2] sm:$0x3] }
  0x1a   : > { %332 = vrot.lane.b32.xlu1 %v323_v4, %s581_s11  ;;  %532 = vmatprep.subr.mxu0 %v579_v2 }
  0x1b   : > { %533 = vmatpush3.msra.mxu0 %v241_v6 }
  0x1c   : > { %535 = vmatmul.mubr.msk.f32.vlgmr.msra.gmra.mxu0 %vm245_vm2, %v240_v7 }
  0x1e   : > { %359 = vrot.lane.b32.xlu1 %v323_v4, %s582_s17 }
  0x8c   : > { %v333_v28 = vpop.permute.xlu1 %332 }
  0x90   : > { %v360_v30 = vpop.permute.xlu1 %359 }
  0xdc   : > { %v315_v9 = vpop.f32.mrf.mxu0 }
  0xdd   : > { %v320_v11 = vadd.f32 %v319_v8, %v315_v9  ;;  %v322_v13 = vadd.f32 %v321_v10, %v315_v9 }
  0xde   : > { %v536_v12 = vpop.f32.mrf.mxu0 }
  0xdf   : > { %554 = vtanh.f32 %v320_v11  ;;  %v517_v16 = vmul.f32 -1.442695, %v320_v11  ;;  %v518_v17 = vmul.f32 -1.442695, %v322_v13 }
  0xe0   : > { %556 = vtanh.f32 %v322_v13 }
  0xe1   : > { %558 = vpow2.f32 %v517_v16 }
  0xe2   : > { %560 = vpow2.f32 %v518_v17 }
  0xec   : > { %v555_v14 = vpop.eup %554 }
  0xed   : > { %337 = vrot.lane.b32.xlu0 %v555_v14, %s583_s18  ;;  %v557_v15 = vpop.eup %556 }
  0xee   : > { %v559_v18 = vpop.eup %558 }
  0xef   : > { %v327_v19 = vadd.f32 1.0, %v559_v18  ;;  %v561_v20 = vpop.eup %560 }
  0xf0   : > { %v355_v21 = vadd.f32 1.0, %v561_v20 }
  0xf1   : > { %364 = vrot.lane.b32.xlu0 %v557_v15, %s583_s18  ;;  %562 = vrcp.f32 %v327_v19 }
  0xf2   : > { %564 = vrcp.f32 %v355_v21 }
  0xfe   : > { %v563_v22 = vpop.eup %562 }
  0xff   : > { %v565_v25 = vpop.eup %564  ;;  %v335_v29 = vmul.f32 %v563_v22, %v333_v28 }
 0x100   : > { %v362_v33 = vmul.f32 %v565_v25, %v360_v30 }
 0x15f   : > { %v338_v23 = vpop.permute.xlu0 %337 }
 0x160   : > { %v340_v24 = vmul.f32 %v563_v22, %v338_v23 }
 0x162   : > { %342 = vrot.lane.b32.xlu0 %v340_v24, %s581_s11 }
 0x163   : > { %v365_v26 = vpop.permute.xlu0 %364 }
 0x164   : > { %v367_v27 = vmul.f32 %v565_v25, %v365_v26 }
 0x166   : > { %369 = vrot.lane.b32.xlu1 %v367_v27, %s581_s11 }
 0x1d4   : > { %v343_v31 = vpop.permute.xlu0 %342 }
 0x1d5   : > { %v345_v32 = vadd.f32 %v343_v31, %v335_v29 }
 0x1d7   : > { %566 = vtanh.f32 %v345_v32 }
 0x1d8   : > { %v370_v34 = vpop.permute.xlu1 %369 }
 0x1d9   : > { %v372_v35 = vadd.f32 %v370_v34, %v362_v33 }
 0x1db   : > { %568 = vtanh.f32 %v372_v35 }
 0x1e4   : > { %v567_v36 = vpop.eup %566 }
 0x1e5   : > { %348 = vrot.lane.b32.xlu0 %v567_v36, %s584_s19 }
 0x1e8   : > { %v569_v37 = vpop.eup %568 }
 0x1e9   : > { %375 = vrot.lane.b32.xlu1 %v569_v37, %s584_s19  ;;  %392 = vrot.lane.b32.xlu0 %v345_v32, %s585_s20 }
 0x257   : > { %v349_v38 = vpop.permute.xlu0 %348 }
 0x258   : > { %v351_v39 = vmul.f32 %v563_v22, %v349_v38 }
 0x25a   : > { %380 = vrot.lane.b32.xlu0 %v351_v39, %s586_s21 }
 0x25b   : > { %v376_v40 = vpop.permute.xlu1 %375  ;;  %v393_v42 = vpop.permute.xlu0 %392 }
 0x25c   : > { %v378_v41 = vmul.f32 %v565_v25, %v376_v40 }
 0x25e   : > { %384 = vrot.lane.b32.xlu1 %v378_v41, %s584_s19  ;;  %403 = vrot.lane.b32.xlu0 %v378_v41, %s581_s11 }
 0x262   : > { %396 = vrot.lane.b32.xlu1 %v372_v35, %s582_s17 }
 0x2cc   : > { %v381_v43 = vpop.permute.xlu0 %380 }
 0x2cd   : > { %402 = vst.msk [vmem:[%s633_s29] sm:$0x3] %vm401_vm3, %v381_v43 }
 0x2d0   : > { %v385_v44 = vpop.permute.xlu1 %384  ;;  %v404_v45 = vpop.permute.xlu0 %403 }
 0x2d1   : > { %v388_v46 = vsel %vm387_vm4, %v381_v43, %v385_v44  ;;  %406 = vst.msk [vmem:[%s638_s6] sm:$0x3] %vm401_vm3, %v404_v45 }
 0x2d2   : > { %390 = vst.msk [vmem:[#allocation2] sm:$0x3] %vm389_vm5, %v388_v46 }
 0x2d4   : > { %v397_v47 = vpop.permute.xlu1 %396 }
 0x2d5   : > { %v399_v48 = vsel %vm387_vm4, %v393_v42, %v397_v47 }
 0x2d6   : > { %400 = vst.msk [vmem:[#allocation3] sm:$0x3] %vm389_vm5, %v399_v48 }
 0x2d7 PF: > { %s15_s15 = sadd.s32 1, %s576_s15  }
 0x2d8   : > { %p12_p6 = scmp.ge.s32.totalorder %s15_s15, 10  }
 0x2da   :  { %14 = sbr.rel (!%p12_p6) target bundleno = 1 (0x1), region = 81 }

// kernel: bilstm_cnn_forward.7
= control target key start
LH: loop header
LB: loop body
LE: loop exit
PB: predicated region body
PF: predicated region fallthrough
CT: control target
= control target key end

     0   :  { %s545_s25 = smov 16   ;;  %s661_s0 = inlined_call_operand.vmem [shape: f32[16,16], index: 0, kind: input, shape index: {}]   ;;  %s662_s1 = inlined_call_operand.vmem [shape: f32[16,16], index: 1, kind: input, shape index: {}]   ;;  %s663_s2 = inlined_call_operand.vmem [shape: f32[3,32,32], index: 2, kind: input, shape index: {}]   ;;  %s664_s3 = inlined_call_operand.vmem [shape: f32[1,32], index: 3, kind: input, shape index: {}]   ;;  %s665_s4 = inlined_call_operand.vmem [shape: f32[32,64], index: 4, kind: input, shape index: {}]   ;;  %s666_s5 = inlined_call_operand.vmem [shape: f32[1,64], index: 5, kind: input, shape index: {}]   ;;  %s667_s6 = inlined_call_operand.hbm [shape: f32[2,8,64], index: 6, kind: output, shape index: {}]  }
   0x1   :  { %v26_v0 = vld [vmem:[%s662_s1] sm:$0xff]  ;;  %v42_v1 = vld [vmem:[%s663_s2 + $0x18] sm:$0xff]  ;;  %v41_v3 = vld [vmem:[%s663_s2 + $0x10] sm:$0xff] }
   0x2   :  { %30 = vrot.lane.b32.xlu0 %v26_v0, %s545_s25  ;;  %475 = vmatprep.subr.mxu0 %v42_v1  ;;  %v442_v2 = vld [vmem:[%s663_s2 + $0x58] sm:$0xff]  ;;  %v441_v4 = vld [vmem:[%s663_s2 + $0x50] sm:$0xff]  ;;  %v27_v5 = vld [vmem:[%s662_s1 + $0x8] sm:$0xff] }
   0x3   :  { %476 = vmatpush3.msra.mxu0 %v42_v1  ;;  %486 = vmatprep.subr.mxu1 %v442_v2  ;;  %v40_v6 = vld [vmem:[%s663_s2 + $0x8] sm:$0xff]  ;;  %v39_v8 = vld [vmem:[%s663_s2] sm:$0xff] }
   0x4   :  { %477 = vmatprep.subr.mxu0 %v41_v3  ;;  %487 = vmatpush3.msra.mxu1 %v442_v2  ;;  %v440_v7 = vld [vmem:[%s663_s2 + $0x48] sm:$0xff] }
   0x5   :  { %478 = vmatpush3.msra.mxu0 %v41_v3  ;;  %488 = vmatprep.subr.mxu1 %v441_v4 }
   0x6   :  { %32 = vrot.lane.b32.xlu0 %v27_v5, %s545_s25  ;;  %479 = vmatprep.subr.mxu0 %v40_v6 }
   0x7   :  { %11 = vsyncpa [#allocation4], 0  ;;  %489 = vmatpush3.msra.mxu1 %v441_v4  ;;  %480 = vmatpush3.msra.mxu0 %v40_v6  ;;  %v439_v9 = vld [vmem:[%s663_s2 + $0x40] sm:$0xff]  ;;  %v438_v10 = vld [vmem:[%s663_s2 + $0x38] sm:$0xff]  ;;  %vm36_vm0 = vcmask 130048   ;;  %vm43_vm1 = vcmask 261120  }
   0x8   :  { %490 = vmatprep.subr.mxu1 %v440_v7  ;;  %481 = vmatprep.subr.mxu0 %v39_v8  ;;  %v24_v11 = vld [vmem:[%s661_s0] sm:$0xff]  ;;  %v25_v14 = vld [vmem:[%s661_s0 + $0x8] sm:$0xff]  ;;  %v437_v17 = vld [vmem:[%s663_s2 + $0x30] sm:$0xff]  ;;  %vm212_vm2 = vcmask 1041408   ;;  %vm296_vm3 = vcmask 1045504   ;;  %vm408_vm4 = vcmask 523264  }
   0x9   :  { %491 = vmatpush3.msra.mxu1 %v440_v7  ;;  %482 = vmatpush3.msra.mxu0 %v39_v8  ;;  %v436_v18 = vld [vmem:[%s663_s2 + $0x28] sm:$0xff]  ;;  %v435_v19 = vld [vmem:[%s663_s2 + $0x20] sm:$0xff]  ;;  %v319_v20 = vld [vmem:[%s665_s4 + $0x18] sm:$0xff] }
   0xa   :  { %492 = vmatprep.subr.mxu1 %v439_v9  ;;  %497 = vmatprep.subr.mxu0 %v438_v10  ;;  %v318_v21 = vld [vmem:[%s665_s4 + $0x10] sm:$0xff]  ;;  %v317_v22 = vld [vmem:[%s665_s4 + $0x8] sm:$0xff]  ;;  %v316_v23 = vld [vmem:[%s665_s4] sm:$0xff] }
   0xb   :  { %493 = vmatpush3.msra.mxu1 %v439_v9  ;;  %v447_v39 = vld [vmem:[%s664_s3] ss:$0 sm:$0xff]  ;;  %s546_s3 = smov [#allocation3]  }
   0xc   :  { %508 = vmatprep.subr.mxu1 %v319_v20  ;;  %v448_v47 = vld [vmem:[%s666_s5] ss:$0 sm:$0xff]  ;;  %s422_s14 = sshll.u32 %s546_s3, 4  ;;  %s423_s14 = int_to_ptr.vmem [resolvable:$true] %s422_s14 }
   0xd   :  { %s523_s15 = scalar_lea.vmem %s423_s14, 256  ;;  %p528_p1 = scmp.lt.s32.totalorder %s423_s14, %s423_s14 }
   0xe   :  { %p524_p0 = scmp.ne.s32.totalorder %s423_s14, %s523_s15  ;;  %p529_p2 = scmp.lt.s32.totalorder %s523_s15, %s523_s15 }
  0x10   :  { %p530_p3 = por %p529_p2, %p528_p1 }
  0x12   :  { %p531_p4 = pnand %p530_p3, %p524_p0 }
  0x74   :  { %v31_v12 = vpop.permute.xlu0 %30 }
  0x75   :  { %v37_v13 = vsel %vm36_vm0, %v24_v11, %v31_v12 }
  0x76   :  { %483 = vmatprep.mubr.msk.f32.mxu0 %vm43_vm1, %v37_v13  ;;  %494 = vmatprep.mubr.msk.f32.mxu1 %vm43_vm1, %v37_v13 }
  0x78   :  { %v33_v15 = vpop.permute.xlu0 %32 }
  0x79   :  { %v38_v16 = vsel %vm36_vm0, %v25_v14, %v33_v15 }
  0x7a   :  { %484 = vmatmul.mubr.msk.f32.vlgmr.msra.gmra.mxu0 %vm43_vm1, %v38_v16  ;;  %495 = vmatmul.mubr.msk.f32.vlgmr.msra.gmra.mxu1 %vm43_vm1, %v38_v16 }
  0x7b   :  { %498 = vmatpush3.msra.mxu0 %v438_v10  ;;  %505 = vmatprep.mubr.msk.f32.mxu0 %vm43_vm1, %v37_v13 }
  0x7c   :  { %499 = vmatprep.subr.mxu0 %v437_v17  ;;  %509 = vmatpush3.msra.mxu1 %v319_v20 }
  0x7d   :  { %500 = vmatpush3.msra.mxu0 %v437_v17  ;;  %510 = vmatprep.subr.mxu1 %v318_v21 }
  0x7e   :  { %501 = vmatprep.subr.mxu0 %v436_v18  ;;  %511 = vmatpush3.msra.mxu1 %v318_v21 }
  0x7f   :  { %502 = vmatpush3.msra.mxu0 %v436_v18  ;;  %512 = vmatprep.subr.mxu1 %v317_v22 }
  0x80   :  { %503 = vmatprep.subr.mxu0 %v435_v19  ;;  %513 = vmatpush3.msra.mxu1 %v317_v22 }
  0x81   :  { %504 = vmatpush3.msra.mxu0 %v435_v19  ;;  %514 = vmatprep.subr.mxu1 %v316_v23 }
  0x82   :  { %506 = vmatmul.mubr.msk.f32.vlgmr.msra.gmra.mxu0 %vm43_vm1, %v38_v16  ;;  %515 = vmatpush3.msra.mxu1 %v316_v23 }
 0x13a   :  { %v485_v24 = vpop.f32.mrf.mxu0  ;;  %v496_v25 = vpop.f32.mrf.mxu1 }
 0x13b   :  { %v214_v29 = vrot.slane %v485_v24, 6  ;;  %v298_v30 = vrot.slane %v496_v25, 2 }
 0x13c   :  { %v116_v26 = vpop.f32.mrf.mxu0  ;;  %v201_v28 = vpop.f32.mrf.mxu1 }
 0x13d   :  { %v213_v27 = vrot.slane %v116_v26, 6  ;;  %v297_v31 = vrot.slane %v201_v28, 2  ;;  %v302_v35 = vsel %vm296_vm3, %v298_v30, 0.0 }
 0x13f   :  { %v215_v32 = vsel %vm212_vm2, %v213_v27, %v214_v29  ;;  %v218_v36 = vsel %vm212_vm2, 0.0, %v213_v27  ;;  %v299_v41 = vsel %vm296_vm3, %v297_v31, %v298_v30 }
 0x142   :  { %v507_v33 = vpop.f32.mrf.mxu0 }
 0x143   :  { %v291_v34 = vadd.f32 %v507_v33, %v215_v32 }
 0x144   :  { %v285_v37 = vpop.f32.mrf.mxu0 }
 0x145   :  { %v304_v38 = vadd.f32 %v302_v35, %v291_v34  ;;  %v286_v40 = vadd.f32 %v285_v37, %v218_v36 }
 0x147   :  { %v303_v42 = vadd.f32 %v299_v41, %v286_v40  ;;  %v313_v43 = vadd.f32 %v447_v39, %v304_v38 }
 0x149   :  { %v312_v44 = vadd.f32 %v447_v39, %v303_v42  ;;  %v315_v46 = vmax.f32 %v313_v43, 0.0 }
 0x14b   :  { %v314_v45 = vmax.f32 %v312_v44, 0.0 }
 0x14d   :  { %516 = vmatprep.mubr.msk.f32.mxu1 %vm43_vm1, %v314_v45 }
 0x14e   :  { %517 = vmatmul.mubr.msk.f32.vlgmr.msra.gmra.mxu1 %vm43_vm1, %v315_v46 }
 0x20e   :  { %v518_v48 = vpop.f32.mrf.mxu1 }
 0x20f   :  { %v405_v49 = vadd.f32 %v518_v48, %v448_v47 }
 0x210   :  { %v399_v50 = vpop.f32.mrf.mxu1 }
 0x211   :  { %410 = vst.msk [vmem:[#allocation2 + $0x8] sm:$0xff] %vm408_vm4, %v405_v49  ;;  %v400_v51 = vadd.f32 %v448_v47, %v399_v50 }
 0x213   :  { %409 = vst.msk [vmem:[#allocation2] sm:$0xff] %vm408_vm4, %v400_v51 }
 0x21a   :  { %v411_v52 = vld [vmem:[#allocation2] ss:$2 sm:$0xff]  ;;  %v414_v53 = vld [vmem:[#allocation2 + $0x1] ss:$2 sm:$0xff] }
 0x21b   :  { %412 = vst.msk [vmem:[#allocation3] sm:$0xff] %vm408_vm4, %v411_v52  ;;  %416 = vst.msk [vmem:[#allocation3 + $0x8] sm:$0xff] %vm408_vm4, %v414_v53 }
 0x21c   :  { %534 = shalt.err (!%p531_p4)
}
 0x21d   :  { %s547_s5 = smov 128   ;;  %s548_s1 = smov 8  }
 0x21e   :  { %428 = dma.vmem_to_hbm [thread:$0]  %s423_s14, 256, %s667_s6, [#allocation4], %s547_s5, %s547_s5, %s548_s1  }
 0x21f   :  { %543 = dma.done.wait [#allocation4], 256  }
 0x220   :  { %544 = vsyncadd [#allocation4], 4294967040 }
 0x221   :  { %432 = vsyncpa [#allocation4], 1 }

</bundles_post_ra>
